<compile_context>
chip_gen: v6e
topology: v6e:2x2x1
jax: 0.10.0
libtpu: 0.0.40
codegen_flags: <defaults>
</compile_context>

<pallas_src>
import jax
import jax.numpy as jnp
from jax.experimental import pallas as pl
from jax.experimental.pallas import tpu as pltpu


def _make_conv_kernel(N, C, H, W, O, KH, KW, K_PAD, O_PAD):
    HW = H * W
    NHW = N * HW

    def conv_kernel(x_ref, w_ref, b_ref, o_ref, a_ref):
        # x_ref: VMEM (C, N*HW)        input, batches concatenated along lanes
        # w_ref: VMEM (O_PAD, K_PAD)   weights, col index = (kh*KW+kw)*C + c, zero-padded
        # b_ref: VMEM (O_PAD, 1)       bias, zero-padded
        # o_ref: VMEM (O_PAD, N*HW)    output, row o, col n*HW + (h*W + w)
        # a_ref: VMEM (K_PAD, N*HW)    scratch: im2col stack of rolled planes
        x = x_ref[...]                                    # (C, NHW) f32

        # Zero the whole im2col scratch once (covers the K padding rows):
        # 16 dense full-vreg stores, negligible.
        a_ref[...] = jnp.zeros_like(a_ref)

        # One XLU lane rotation per tap (shared by all channels); all C channels
        # of a tap are written together as one contiguous sublane-slice store.
        for kh in range(KH):
            for kw in range(KW):
                s = kh * W + kw
                t = kh * KW + kw
                rolled = x if s == 0 else pltpu.roll(x, shift=NHW - s, axis=1)
                a_ref[pl.ds(t * C, C), :] = rolled

        # Single MXU matmul (full f32 precision), one per-sublane bias add,
        # one dense full-block (8 x 512) store.
        acc = jnp.dot(
            w_ref[...], a_ref[...],
            preferred_element_type=jnp.float32,
            precision=jax.lax.Precision.HIGHEST,
        )
        o_ref[...] = (acc + b_ref[...]).astype(o_ref.dtype)

    return conv_kernel


@jax.jit
def conv2d_pallas_nchw(x_nchw, w_oihw, bias):
    """PyTorch-compatible Conv2d forward (stride=1, padding=0), NCHW in/out."""
    N, C, H, W = x_nchw.shape
    O, _, KH, KW = w_oihw.shape
    OH, OW = H - KH + 1, W - KW + 1
    HW, NHW = H * W, N * H * W
    K = C * KH * KW
    K_PAD = max(32, ((K + 7) // 8) * 8)      # pad contraction dim (27 -> 32)
    O_PAD = max(8, ((O + 7) // 8) * 8)       # pad output channels (6 -> 8)

    kernel = _make_conv_kernel(N, C, H, W, O, KH, KW, K_PAD, O_PAD)

    # (N,C,H,W) -> (C, N*H*W): spatial+batch dense on the lane axis.
    x2 = jnp.transpose(x_nchw, (1, 0, 2, 3)).reshape(C, NHW).astype(jnp.float32)

    # (O,C,KH,KW) -> (O, KH*KW*C) with column index (kh*KW+kw)*C + c, matching
    # the im2col row order; zero-pad to the MXU-friendly (O_PAD, K_PAD).
    w_perm = jnp.transpose(w_oihw, (0, 2, 3, 1)).reshape(O, K).astype(jnp.float32)
    w_mat = jnp.zeros((O_PAD, K_PAD), jnp.float32).at[:O, :K].set(w_perm)
    b_col = jnp.zeros((O_PAD, 1), jnp.float32).at[:O, 0].set(bias.astype(jnp.float32))

    flops = 2 * O_PAD * K_PAD * NHW
    bytes_accessed = 4 * (x2.size + w_mat.size + b_col.size + O_PAD * NHW)

    out_flat = pl.pallas_call(
        kernel,
        out_shape=jax.ShapeDtypeStruct((O_PAD, NHW), jnp.float32),
        in_specs=[
            pl.BlockSpec(memory_space=pltpu.MemorySpace.VMEM),   # x (C, N*HW)
            pl.BlockSpec(memory_space=pltpu.MemorySpace.VMEM),   # W (O_PAD, K_PAD)
            pl.BlockSpec(memory_space=pltpu.MemorySpace.VMEM),   # bias (O_PAD, 1)
        ],
        out_specs=pl.BlockSpec(memory_space=pltpu.MemorySpace.VMEM),
        scratch_shapes=[pltpu.VMEM((K_PAD, NHW), jnp.float32)],
        cost_estimate=pl.CostEstimate(
            flops=flops, transcendentals=0, bytes_accessed=bytes_accessed),
    )(x2, w_mat, b_col)

    # (O_PAD, N*HW) -> (O_PAD, N, H, W) -> valid window -> (N, O, OH, OW).
    out = out_flat.reshape(O_PAD, N, H, W)[:O, :, :OH, :OW]
    return jnp.transpose(out, (1, 0, 2, 3)).astype(x_nchw.dtype)


if __name__ == "__main__":
    key = jax.random.PRNGKey(0)
    kx, kw_, kb = jax.random.split(key, 3)

    # Shapes consistent with the module: batch=2, C_in=3, 16x16 spatial.
    N, C, H, W = 2, 3, 16, 16
    O, KH, KW = 6, 3, 3

    x = jax.random.normal(kx, (N, C, H, W), dtype=jnp.float32)
    fan_in = C * KH * KW
    bound = 1.0 / (fan_in ** 0.5)
    weight = jax.random.uniform(kw_, (O, C, KH, KW), minval=-bound, maxval=bound,
                                dtype=jnp.float32)
    bias = jax.random.uniform(kb, (O,), minval=-bound, maxval=bound,
                              dtype=jnp.float32)

    out = conv2d_pallas_nchw(x, weight, bias)
    out = jax.block_until_ready(out)
    assert out.shape == (N, O, H - KH + 1, W - KW + 1), out.shape

    # Cross-check against XLA's native convolution (same NCHW/OIHW semantics).
    ref = jax.lax.conv_general_dilated(
        x, weight, window_strides=(1, 1), padding="VALID",
        dimension_numbers=("NCHW", "OIHW", "NCHW"),
        precision=jax.lax.Precision.HIGHEST,
    ) + bias[None, :, None, None]
    assert jnp.allclose(out, ref, atol=1e-3, rtol=1e-3), float(
        jnp.max(jnp.abs(out - ref)))

    print("KERNEL_OK")
</pallas_src>

<mosaic_0001>
module attributes {stable_mosaic.version = 11 : i64} {
  func.func @conv_kernel(%arg0: memref<3x512xf32, #tpu.memory_space<vmem>>, %arg1: memref<8x32xf32, #tpu.memory_space<vmem>>, %arg2: memref<8x1xf32, #tpu.memory_space<vmem>>, %arg3: memref<8x512xf32, #tpu.memory_space<vmem>>, %arg4: memref<32x512xf32, #tpu.memory_space<vmem>>) attributes {dimension_semantics = [], scalar_prefetch = 0 : i64, scratch_operands = 1 : i64, tpu.core_type = #tpu.core_type<tc>} {
    %c0 = arith.constant 0 : index
    %c0_0 = arith.constant 0 : index
    %0 = vector.load %arg0[%c0, %c0_0] : memref<3x512xf32, #tpu.memory_space<vmem>>, vector<3x512xf32>
    %cst = arith.constant 0.000000e+00 : f32
    %1 = vector.broadcast %cst : f32 to vector<32x512xf32>
    %c0_1 = arith.constant 0 : index
    %c0_2 = arith.constant 0 : index
    %2 = vector.load %arg4[%c0_1, %c0_2] : memref<32x512xf32, #tpu.memory_space<vmem>>, vector<32x512xf32>
    tpu.vector_store %arg4[%c0_1, %c0_2], %1 {strides = array<i32>} : memref<32x512xf32, #tpu.memory_space<vmem>>, vector<32x512xf32>,
    %c0_3 = arith.constant 0 : index
    %c0_4 = arith.constant 0 : index
    %3 = vector.load %arg4[%c0_3, %c0_4] : memref<32x512xf32, #tpu.memory_space<vmem>>, vector<3x512xf32>
    tpu.vector_store %arg4[%c0_3, %c0_4], %0 {strides = array<i32>} : memref<32x512xf32, #tpu.memory_space<vmem>>, vector<3x512xf32>,
    %c511_i32 = arith.constant 511 : i32
    %4 = tpu.dynamic_rotate %0 by %c511_i32 dim 1 : vector<3x512xf32>, i32 -> vector<3x512xf32>
    %c3 = arith.constant 3 : index
    %c0_5 = arith.constant 0 : index
    %5 = vector.load %arg4[%c3, %c0_5] : memref<32x512xf32, #tpu.memory_space<vmem>>, vector<3x512xf32>
    tpu.vector_store %arg4[%c3, %c0_5], %4 {strides = array<i32>} : memref<32x512xf32, #tpu.memory_space<vmem>>, vector<3x512xf32>,
    %c510_i32 = arith.constant 510 : i32
    %6 = tpu.dynamic_rotate %0 by %c510_i32 dim 1 : vector<3x512xf32>, i32 -> vector<3x512xf32>
    %c6 = arith.constant 6 : index
    %c0_6 = arith.constant 0 : index
    %7 = vector.load %arg4[%c6, %c0_6] : memref<32x512xf32, #tpu.memory_space<vmem>>, vector<3x512xf32>
    tpu.vector_store %arg4[%c6, %c0_6], %6 {strides = array<i32>} : memref<32x512xf32, #tpu.memory_space<vmem>>, vector<3x512xf32>,
    %c496_i32 = arith.constant 496 : i32
    %8 = tpu.dynamic_rotate %0 by %c496_i32 dim 1 : vector<3x512xf32>, i32 -> vector<3x512xf32>
    %c9 = arith.constant 9 : index
    %c0_7 = arith.constant 0 : index
    %9 = vector.load %arg4[%c9, %c0_7] : memref<32x512xf32, #tpu.memory_space<vmem>>, vector<3x512xf32>
    tpu.vector_store %arg4[%c9, %c0_7], %8 {strides = array<i32>} : memref<32x512xf32, #tpu.memory_space<vmem>>, vector<3x512xf32>,
    %c495_i32 = arith.constant 495 : i32
    %10 = tpu.dynamic_rotate %0 by %c495_i32 dim 1 : vector<3x512xf32>, i32 -> vector<3x512xf32>
    %c12 = arith.constant 12 : index
    %c0_8 = arith.constant 0 : index
    %11 = vector.load %arg4[%c12, %c0_8] : memref<32x512xf32, #tpu.memory_space<vmem>>, vector<3x512xf32>
    tpu.vector_store %arg4[%c12, %c0_8], %10 {strides = array<i32>} : memref<32x512xf32, #tpu.memory_space<vmem>>, vector<3x512xf32>,
    %c494_i32 = arith.constant 494 : i32
    %12 = tpu.dynamic_rotate %0 by %c494_i32 dim 1 : vector<3x512xf32>, i32 -> vector<3x512xf32>
    %c15 = arith.constant 15 : index
    %c0_9 = arith.constant 0 : index
    %13 = vector.load %arg4[%c15, %c0_9] : memref<32x512xf32, #tpu.memory_space<vmem>>, vector<3x512xf32>
    tpu.vector_store %arg4[%c15, %c0_9], %12 {strides = array<i32>} : memref<32x512xf32, #tpu.memory_space<vmem>>, vector<3x512xf32>,
    %c480_i32 = arith.constant 480 : i32
    %14 = tpu.dynamic_rotate %0 by %c480_i32 dim 1 : vector<3x512xf32>, i32 -> vector<3x512xf32>
    %c18 = arith.constant 18 : index
    %c0_10 = arith.constant 0 : index
    %15 = vector.load %arg4[%c18, %c0_10] : memref<32x512xf32, #tpu.memory_space<vmem>>, vector<3x512xf32>
    tpu.vector_store %arg4[%c18, %c0_10], %14 {strides = array<i32>} : memref<32x512xf32, #tpu.memory_space<vmem>>, vector<3x512xf32>,
    %c479_i32 = arith.constant 479 : i32
    %16 = tpu.dynamic_rotate %0 by %c479_i32 dim 1 : vector<3x512xf32>, i32 -> vector<3x512xf32>
    %c21 = arith.constant 21 : index
    %c0_11 = arith.constant 0 : index
    %17 = vector.load %arg4[%c21, %c0_11] : memref<32x512xf32, #tpu.memory_space<vmem>>, vector<3x512xf32>
    tpu.vector_store %arg4[%c21, %c0_11], %16 {strides = array<i32>} : memref<32x512xf32, #tpu.memory_space<vmem>>, vector<3x512xf32>,
    %c478_i32 = arith.constant 478 : i32
    %18 = tpu.dynamic_rotate %0 by %c478_i32 dim 1 : vector<3x512xf32>, i32 -> vector<3x512xf32>
    %c24 = arith.constant 24 : index
    %c0_12 = arith.constant 0 : index
    %19 = vector.load %arg4[%c24, %c0_12] : memref<32x512xf32, #tpu.memory_space<vmem>>, vector<3x512xf32>
    tpu.vector_store %arg4[%c24, %c0_12], %18 {strides = array<i32>} : memref<32x512xf32, #tpu.memory_space<vmem>>, vector<3x512xf32>,
    %c0_13 = arith.constant 0 : index
    %c0_14 = arith.constant 0 : index
    %20 = vector.load %arg1[%c0_13, %c0_14] : memref<8x32xf32, #tpu.memory_space<vmem>>, vector<8x32xf32>
    %c0_15 = arith.constant 0 : index
    %c0_16 = arith.constant 0 : index
    %21 = vector.load %arg4[%c0_15, %c0_16] : memref<32x512xf32, #tpu.memory_space<vmem>>, vector<32x512xf32>
    %cst_17 = arith.constant dense<0.000000e+00> : vector<8x512xf32>
    %22 = tpu.matmul %20, %21, %cst_17 {dimension_numbers = #tpu.dot_dimension_numbers<[1], [0], [0], [1], [0, 0, 1, 1], [], []>, precision = #tpu.contract_precision<fp32>} : vector<8x32xf32>, vector<32x512xf32>, vector<8x512xf32> -> vector<8x512xf32>
    %c0_18 = arith.constant 0 : index
    %c0_19 = arith.constant 0 : index
    %23 = vector.load %arg2[%c0_18, %c0_19] : memref<8x1xf32, #tpu.memory_space<vmem>>, vector<8x1xf32>
    %24 = vector.broadcast %23 : vector<8x1xf32> to vector<8x512xf32>
    %25 = arith.addf %22, %24 : vector<8x512xf32>
    %c0_20 = arith.constant 0 : index
    %c0_21 = arith.constant 0 : index
    %26 = vector.load %arg3[%c0_20, %c0_21] : memref<8x512xf32, #tpu.memory_space<vmem>>, vector<8x512xf32>
    tpu.vector_store %arg3[%c0_20, %c0_21], %25 {strides = array<i32>} : memref<8x512xf32, #tpu.memory_space<vmem>>, vector<8x512xf32>,
    return
  }
}

</mosaic_0001>

<bundles_post_ra>
// kernel: conv2d_pallas_nchw.1
= control target key start
LH: loop header
LB: loop body
LE: loop exit
PB: predicated region body
PF: predicated region fallthrough
CT: control target
= control target key end

     0   :  { %v1406_v2 = vmov 0.0   ;;  %s1408_s16 = smov 110   ;;  %s1409_s17 = smov 95   ;;  %v1415_v5 = vmov 0   ;;  %v50_v7 = vlaneseq  ;;  %vm295_vm7 = vcmask 261120   ;;  %s1861_s0 = inlined_call_operand.vmem [shape: f32[3,512], index: 0, kind: input, shape index: {}]   ;;  %s1862_s2 = inlined_call_operand.vmem [shape: f32[8,1], index: 2, kind: input, shape index: {}]   ;;  %s1863_s1 = inlined_call_operand.vmem [shape: f32[8,32], index: 1, kind: input, shape index: {}]   ;;  %s1864_s3 = inlined_call_operand.vmem [shape: f32[8,512], index: 3, kind: output, shape index: {}]  }
   0x1   :  { %v15_v0 = vld [vmem:[%s1861_s0 + $0x8] sm:$0x77]  ;;  %v14_v1 = vld [vmem:[%s1861_s0] sm:$0x77]  ;;  %25 = vst [vmem:[#allocation2 + $0x20] sm:$0xff] %v1406_v2  ;;  %16 = vst [vmem:[#allocation2 + $0x30] sm:$0xff] %v1406_v2  ;;  %371 = vmatprep.mubr.f32.mxu0 %v1406_v2  ;;  %487 = vmatprep.mubr.f32.mxu1 %v1406_v2 }
   0x2   :  { %17 = vst [vmem:[#allocation2] sm:$0xff] %v1406_v2  ;;  %18 = vst [vmem:[#allocation2 + $0x58] sm:$0xff] %v1406_v2  ;;  %s1407_s0 = smov 96   ;;  %168 = vrot.lane.b32.xlu0 %v15_v0, %s1408_s16  ;;  %v34_v3 = vcombine.high %v14_v1, %v14_v1  ;;  %v35_v4 = vcombine.high %v15_v0, %v15_v0  ;;  %s1410_s18 = smov 94   ;;  %v289_v6 = vld [vmem:[%s1862_s2] sm:$0xff]  ;;  %v1471_v8 = vand.u32 127, %v50_v7 }
   0x3   :  { %19 = vst [vmem:[#allocation2 + $0x18] sm:$0xff] %v1406_v2  ;;  %20 = vst [vmem:[#allocation2 + $0x50] sm:$0xff] %v1406_v2  ;;  %201 = vrot.lane.b32.xlu1 %v15_v0, %s1407_s0  ;;  %s1411_s19 = smov 126   ;;  %s1412_s20 = smov 112   ;;  %1403 = vset.pattern.permute.xlu0 %v1415_v5 }
   0x4   :  { %21 = vst [vmem:[#allocation2 + $0x68] sm:$0xff] %v1406_v2  ;;  %22 = vst [vmem:[#allocation2 + $0x8] sm:$0xff] %v1406_v2  ;;  %s1413_s21 = smov 111   ;;  %s1414_s22 = smov 127   ;;  %vm205_vm0 = vcmp.lt.s32.totalorder %v1471_v8, 96  ;;  %vm172_vm1 = vcmp.lt.s32.totalorder %v1471_v8, 110 }
   0x5   :  { %23 = vst [vmem:[#allocation2 + $0x48] sm:$0xff] %v1406_v2  ;;  %24 = vst [vmem:[#allocation2 + $0x40] sm:$0xff] %v1406_v2  ;;  %vm234_vm2 = vcmp.lt.s32.totalorder %v1471_v8, 95  ;;  %vm263_vm3 = vcmp.lt.s32.totalorder %v1471_v8, 94  ;;  %vm81_vm4 = vcmp.lt.s32.totalorder %v1471_v8, 126  ;;  %vm114_vm5 = vcmp.lt.s32.totalorder %v1471_v8, 112 }
   0x6   :  { %26 = vst [vmem:[#allocation2 + $0x10] sm:$0xff] %v1406_v2  ;;  %27 = vst [vmem:[#allocation2 + $0x38] sm:$0xff] %v1406_v2  ;;  %166 = vrot.lane.b32.xlu0 %v34_v3, %s1408_s16  ;;  %vm143_vm6 = vcmp.lt.s32.totalorder %v1471_v8, 111  ;;  %vm52_vm8 = vcmp.lt.s32.totalorder %v1471_v8, 127 }
   0x7   :  { %28 = vst [vmem:[#allocation2 + $0x60] sm:$0xff] %v1406_v2  ;;  %29 = vst [vmem:[#allocation2 + $0x70] sm:$0xff] %v1406_v2  ;;  %199 = vrot.lane.b32.xlu1 %v34_v3, %s1407_s0 }
   0x8   :  { %30 = vst [vmem:[#allocation2 + $0x78] sm:$0xff] %v1406_v2  ;;  %31 = vst [vmem:[#allocation2 + $0x28] sm:$0xff] %v1406_v2 }
   0x9   :  { %38 = vst [vmem:[#allocation2 + $0x30] sm:$0x7] %v14_v1  ;;  %40 = vst [vmem:[#allocation2 + $0x58] sm:$0x7] %v15_v0 }
   0xa   :  { %39 = vst [vmem:[#allocation2] sm:$0x7] %v34_v3  ;;  %41 = vst [vmem:[#allocation2 + $0x18] sm:$0x7] %v35_v4  ;;  %228 = vrot.lane.b32.xlu0 %v34_v3, %s1409_s17 }
   0xb   :  { %230 = vrot.lane.b32.xlu1 %v15_v0, %s1409_s17 }
   0xe   :  { %257 = vrot.lane.b32.xlu0 %v34_v3, %s1410_s18 }
   0xf   :  { %259 = vrot.lane.b32.xlu1 %v15_v0, %s1410_s18 }
  0x12   :  { %164 = vrot.lane.b32.xlu0 %v14_v1, %s1408_s16 }
  0x13   :  { %197 = vrot.lane.b32.xlu1 %v14_v1, %s1407_s0 }
  0x16   :  { %226 = vrot.lane.b32.xlu0 %v14_v1, %s1409_s17 }
  0x17   :  { %255 = vrot.lane.b32.xlu1 %v14_v1, %s1410_s18 }
  0x1a   :  { %75 = vrot.lane.b32.xlu0 %v34_v3, %s1411_s19 }
  0x1b   :  { %77 = vrot.lane.b32.xlu1 %v15_v0, %s1411_s19 }
  0x1e   :  { %108 = vrot.lane.b32.xlu0 %v34_v3, %s1412_s20 }
  0x1f   :  { %110 = vrot.lane.b32.xlu1 %v15_v0, %s1412_s20 }
  0x22   :  { %137 = vrot.lane.b32.xlu0 %v34_v3, %s1413_s21 }
  0x23   :  { %139 = vrot.lane.b32.xlu1 %v15_v0, %s1413_s21 }
  0x26   :  { %73 = vrot.lane.b32.xlu0 %v14_v1, %s1411_s19 }
  0x27   :  { %106 = vrot.lane.b32.xlu1 %v14_v1, %s1412_s20 }
  0x2a   :  { %135 = vrot.lane.b32.xlu0 %v14_v1, %s1413_s21 }
  0x2b   :  { %44 = vrot.lane.b32.xlu1 %v34_v3, %s1414_s22 }
  0x2e   :  { %46 = vrot.lane.b32.xlu0 %v15_v0, %s1414_s22  ;;  %v272_v0 = vld [vmem:[%s1863_s1] sm:$0xff] }
  0x2f   :  { %42 = vrot.lane.b32.xlu1 %v14_v1, %s1414_s22 }
  0x32   :  { %170 = vrot.lane.b32.xlu0 %v35_v4, %s1408_s16 }
  0x33   :  { %203 = vrot.lane.b32.xlu1 %v35_v4, %s1407_s0 }
  0x36   :  { %232 = vrot.lane.b32.xlu0 %v35_v4, %s1409_s17 }
  0x37   :  { %261 = vrot.lane.b32.xlu1 %v35_v4, %s1410_s18 }
  0x3a   :  { %79 = vrot.lane.b32.xlu0 %v35_v4, %s1411_s19 }
  0x3b   :  { %112 = vrot.lane.b32.xlu1 %v35_v4, %s1412_s20 }
  0x3e   :  { %141 = vrot.lane.b32.xlu0 %v35_v4, %s1413_s21 }
  0x3f   :  { %48 = vrot.lane.b32.xlu1 %v35_v4, %s1414_s22 }
  0x42   :  { %292 = vperm.xlu0 %1403, %v289_v6  }
  0x74   :  { %v1475_v10 = vpop.permute.xlu0 %168 }
  0x75   :  { %v1473_v9 = vpop.permute.xlu1 %201 }
  0x78   :  { %v167_v12 = vpop.permute.xlu0 %166 }
  0x79   :  { %v200_v11 = vpop.permute.xlu1 %199  ;;  %v174_v14 = vsel %vm172_vm1, %v167_v12, %v1475_v10 }
  0x7a   :  { %v207_v13 = vsel %vm205_vm0, %v200_v11, %v1473_v9  ;;  %v182_v16 = vrot.slane %v174_v14, 1 }
  0x7b   :  { %v215_v15 = vrot.slane %v207_v13, 6 }
  0x7c   :  { %190 = vst [vmem:[#allocation2 + $0x20] ss:$76 sps:$4 sm:$0x83] %v182_v16   ;;  %v229_v18 = vpop.permute.xlu0 %228 }
  0x7d   :  { %223 = vst [vmem:[#allocation2 + $0x20] sm:$0x1c] %v215_v15  ;;  %v1486_v17 = vpop.permute.xlu1 %230 }
  0x7e   :  { %v236_v19 = vsel %vm234_vm2, %v229_v18, %v1486_v17 }
  0x7f   :  { %v244_v20 = vrot.slane %v236_v19, 3 }
  0x80   :  { %v258_v22 = vpop.permute.xlu0 %257 }
  0x81   :  { %252 = vst [vmem:[#allocation2 + $0x20] sm:$0xe0] %v244_v20  ;;  %v1492_v21 = vpop.permute.xlu1 %259 }
  0x82   :  { %v265_v23 = vsel %vm263_vm3, %v258_v22, %v1492_v21 }
  0x83   :  { %269 = vst [vmem:[#allocation2 + $0x70] sm:$0x7] %v265_v23 }
  0x84   :  { %v1499_v25 = vpop.permute.xlu0 %164 }
  0x85   :  { %v1497_v24 = vpop.permute.xlu1 %197  ;;  %v175_v27 = vsel %vm172_vm1, %v1499_v25, %v167_v12  ;;  %v297_v12 = vsel %vm295_vm7, %v272_v0, 0 }
  0x86   :  { %v208_v26 = vsel %vm205_vm0, %v1497_v24, %v200_v11  ;;  %v181_v29 = vrot.slane %v175_v27, 1  ;;  %v1590_v23 = vand.u32 4294901760, %v297_v12 }
  0x87   :  { %v214_v28 = vrot.slane %v208_v26, 6 }
  0x88   :  { %189 = vst [vmem:[#allocation2 + $0x40] ss:$20 sps:$4 sm:$0x83] %v181_v29   ;;  %v1509_v31 = vpop.permute.xlu0 %226  ;;  %v282_v32 = vld [vmem:[#allocation2 + $0x20] sm:$0xff] }
  0x89   :  { %222 = vst [vmem:[#allocation2 + $0x40] sm:$0x1c] %v214_v28  ;;  %v1507_v30 = vpop.permute.xlu1 %255  ;;  %v237_v34 = vsel %vm234_vm2, %v1509_v31, %v229_v18  ;;  %v1520_v38 = vand.u32 4294901760, %v282_v32 }
  0x8a   :  { %v266_v33 = vsel %vm263_vm3, %v1507_v30, %v258_v22  ;;  %v286_v35 = vld [vmem:[#allocation2 + $0x70] sm:$0xff]  ;;  %v243_v36 = vrot.slane %v237_v34, 3  ;;  %v1603_v34 = vsub.f32 %v297_v12, %v1590_v23 }
  0x8b   :  { %268 = vst [vmem:[#allocation2 + $0x60] sm:$0x7] %v266_v33  ;;  %v1517_v37 = vand.u32 4294901760, %v286_v35  ;;  %v1534_v45 = vsub.f32 %v282_v32, %v1520_v38 }
  0x8c   :  { %251 = vst [vmem:[#allocation2 + $0x40] sm:$0xe0] %v243_v36  ;;  %v76_v40 = vpop.permute.xlu0 %75 }
  0x8d   :  { %v1522_v39 = vpop.permute.xlu1 %77  ;;  %324 = vmatprep.subr.mxu0 %v1517_v37  ;;  %v1526_v41 = vsub.f32 %v286_v35, %v1517_v37  ;;  %v421_v55 = vand.u32 4294901760, %v1534_v45 }
  0x8e   :  { %v83_v42 = vsel %vm81_vm4, %v76_v40, %v1522_v39 }
  0x8f   :  { %v91_v43 = vrot.slane %v83_v42, 2  ;;  %v409_v44 = vand.u32 4294901760, %v1526_v41  ;;  %v422_v1 = vsub.f32 %v1534_v45, %v421_v55 }
  0x90   :  { %v109_v47 = vpop.permute.xlu0 %108 }
  0x91   :  { %99 = vst [vmem:[#allocation2 + $0x68] ss:$-100 sps:$4 sm:$0xc1] %v91_v43   ;;  %v1536_v46 = vpop.permute.xlu1 %110  ;;  %v410_v48 = vsub.f32 %v1526_v41, %v409_v44  ;;  %v423_v18 = vand.u32 4294901760, %v422_v1 }
  0x92   :  { %v116_v49 = vsel %vm114_vm5, %v109_v47, %v1536_v46  ;;  %v285_v50 = vld [vmem:[#allocation2 + $0x60] sm:$0xff] }
  0x93   :  { %v124_v51 = vrot.slane %v116_v49, 7  ;;  %v1544_v52 = vand.u32 4294901760, %v285_v50  ;;  %v411_v53 = vand.u32 4294901760, %v410_v48  ;;  %v281_v54 = vld [vmem:[#allocation2 + $0x40] sm:$0xff] }
  0x94   :  { %v138_v57 = vpop.permute.xlu0 %137  ;;  %v1551_v58 = vand.u32 4294901760, %v281_v54 }
  0x95   :  { %132 = vst [vmem:[#allocation2 + $0x68] sm:$0xe] %v124_v51  ;;  %v1548_v56 = vpop.permute.xlu1 %139  ;;  %326 = vmatpush1.msra.mxu0 %v1544_v52  ;;  %412 = vmatprep.subr.mxu1 %v411_v53  ;;  %v1554_v59 = vsub.f32 %v285_v50, %v1544_v52  ;;  %v1617_v50 = vand.u32 4294901760, %v1603_v34 }
  0x96   :  { %v145_v60 = vsel %vm143_vm6, %v138_v57, %v1548_v56  ;;  %328 = vmatprep.subr.mxu0 %v1520_v38  ;;  %v1563_v63 = vsub.f32 %v281_v54, %v1551_v58 }
  0x97   :  { %v153_v61 = vrot.slane %v145_v60, 4  ;;  %330 = vmatpush1.msra.mxu0 %v1551_v58  ;;  %v415_v62 = vand.u32 4294901760, %v1554_v59 }
  0x98   :  { %v1573_v4 = vpop.permute.xlu0 %73  ;;  %v427_v6 = vand.u32 4294901760, %v1563_v63 }
  0x99   :  { %161 = vst [vmem:[#allocation2 + $0x68] sm:$0x70] %v153_v61  ;;  %v1571_v3 = vpop.permute.xlu1 %106  ;;  %v416_v5 = vsub.f32 %v1554_v59, %v415_v62  ;;  %v84_v11 = vsel %vm81_vm4, %v1573_v4, %v76_v40 }
  0x9a   :  { %v117_v7 = vsel %vm114_vm5, %v1571_v3, %v109_v47  ;;  %v90_v14 = vrot.slane %v84_v11, 2  ;;  %v428_v16 = vsub.f32 %v1563_v63, %v427_v6 }
  0x9b   :  { %v123_v13 = vrot.slane %v117_v7, 7  ;;  %v417_v15 = vand.u32 4294901760, %v416_v5 }
  0x9c   :  { %98 = vst [vmem:[#allocation2 + $0x50] ss:$-28 sps:$4 sm:$0xc1] %v90_v14   ;;  %v1588_v20 = vpop.permute.xlu0 %135  ;;  %v429_v22 = vand.u32 4294901760, %v428_v16 }
  0x9d   :  { %131 = vst [vmem:[#allocation2 + $0x50] sm:$0xe] %v123_v13  ;;  %v45_v19 = vpop.permute.xlu1 %44  ;;  %418 = vmatpush1.msra.mxu1 %v417_v15  ;;  %v146_v26 = vsel %vm143_vm6, %v1588_v20, %v138_v57 }
  0x9e   :  { %424 = vmatprep.subr.mxu1 %v423_v18  ;;  %v152_v27 = vrot.slane %v146_v26, 4 }
  0x9f   :  { %430 = vmatpush1.msra.mxu1 %v429_v22 }
  0xa0   :  { %v278_v28 = vld [vmem:[#allocation2 + $0x68] sm:$0xff]  ;;  %160 = vst [vmem:[#allocation2 + $0x50] sm:$0x70] %v152_v27  ;;  %v1598_v32 = vpop.permute.xlu0 %46 }
  0xa1   :  { %v1596_v29 = vpop.permute.xlu1 %42  ;;  %v1600_v33 = vand.u32 4294901760, %v278_v28  ;;  %v54_v36 = vsel %vm52_vm8, %v45_v19, %v1598_v32 }
  0xa2   :  { %v55_v35 = vsel %vm52_vm8, %v1596_v29, %v45_v19  ;;  %v62_v42 = vrot.slane %v54_v36, 5 }
  0xa3   :  { %v61_v40 = vrot.slane %v55_v35, 5  ;;  %332 = vmatprep.subr.mxu0 %v1600_v33  ;;  %v1613_v43 = vsub.f32 %v278_v28, %v1600_v33 }
  0xa4   :  { %70 = vst [vmem:[#allocation2] sm:$0x38] %v62_v42  ;;  %v171_v48 = vpop.permute.xlu0 %170 }
  0xa5   :  { %69 = vst [vmem:[#allocation2 + $0x30] sm:$0x38] %v61_v40  ;;  %v204_v47 = vpop.permute.xlu1 %203  ;;  %v433_v49 = vand.u32 4294901760, %v1613_v43  ;;  %v173_v54 = vsel %vm172_vm1, %v1475_v10, %v171_v48  ;;  %v176_v57 = vsel %vm172_vm1, %v171_v48, %v1499_v25  ;;  %v375_v25 = vsub.f32 %v1603_v34, %v1617_v50 }
  0xa6   :  { %v206_v51 = vsel %vm205_vm0, %v1473_v9, %v204_v47  ;;  %v209_v53 = vsel %vm205_vm0, %v204_v47, %v1497_v24  ;;  %v183_v0 = vrot.slane %v173_v54, 1  ;;  %v184_v1 = vrot.slane %v176_v57, 1 }
  0xa7   :  { %v216_v60 = vrot.slane %v206_v51, 6  ;;  %v217_v61 = vrot.slane %v209_v53, 6  ;;  %v277_v5 = vld [vmem:[#allocation2 + $0x50] sm:$0xff]  ;;  %v434_v9 = vsub.f32 %v1613_v43, %v433_v49  ;;  %v1658_v27 = vand.u32 4294901760, %v375_v25 }
  0xa8   :  { %191 = vst [vmem:[#allocation2 + $0x10] ss:$-4 sps:$4 sm:$0x83] %v183_v0   ;;  %192 = vst [vmem:[#allocation2 + $0x38] ss:$20 sps:$4 sm:$0x83] %v184_v1   ;;  %v233_v7 = vpop.permute.xlu0 %232 }
  0xa9   :  { %224 = vst [vmem:[#allocation2 + $0x10] sm:$0x1c] %v216_v60  ;;  %225 = vst [vmem:[#allocation2 + $0x38] sm:$0x1c] %v217_v61  ;;  %v262_v24 = vpop.permute.xlu1 %261  ;;  %v1634_v10 = vand.u32 4294901760, %v277_v5  ;;  %v235_v13 = vsel %vm234_vm2, %v1486_v17, %v233_v7  ;;  %v238_v14 = vsel %vm234_vm2, %v233_v7, %v1509_v31  ;;  %v435_v18 = vand.u32 4294901760, %v434_v9 }
  0xaa   :  { %v264_v11 = vsel %vm263_vm3, %v1492_v21, %v262_v24  ;;  %v267_v12 = vsel %vm263_vm3, %v262_v24, %v1507_v30  ;;  %v245_v15 = vrot.slane %v235_v13, 3  ;;  %v246_v16 = vrot.slane %v238_v14, 3 }
  0xab   :  { %270 = vst [vmem:[#allocation2 + $0x78] sm:$0x7] %v264_v11  ;;  %271 = vst [vmem:[#allocation2 + $0x28] sm:$0x7] %v267_v12  ;;  %334 = vmatpush1.msra.mxu0 %v1634_v10  ;;  %v1652_v21 = vsub.f32 %v277_v5, %v1634_v10  ;;  %v274_v19 = vld [vmem:[#allocation2] sm:$0xff]  ;;  %436 = vmatprep.subr.mxu1 %v435_v18 }
  0xac   :  { %v273_v30 = vld [vmem:[#allocation2 + $0x30] sm:$0xff]  ;;  %253 = vst [vmem:[#allocation2 + $0x10] sm:$0xe0] %v245_v15  ;;  %254 = vst [vmem:[#allocation2 + $0x38] sm:$0xe0] %v246_v16  ;;  %v80_v22 = vpop.permute.xlu0 %79  ;;  %v1654_v26 = vand.u32 4294901760, %v274_v19 }
  0xad   :  { %v113_v17 = vpop.permute.xlu1 %112  ;;  %v1656_v31 = vand.u32 4294901760, %v273_v30  ;;  %v439_v28 = vand.u32 4294901760, %v1652_v21  ;;  %v82_v40 = vsel %vm81_vm4, %v1522_v39, %v80_v22  ;;  %v85_v42 = vsel %vm81_vm4, %v80_v22, %v1573_v4 }
  0xae   :  { %v115_v35 = vsel %vm114_vm5, %v1536_v46, %v113_v17  ;;  %v118_v36 = vsel %vm114_vm5, %v113_v17, %v1571_v3  ;;  %v92_v51 = vrot.slane %v82_v40, 2  ;;  %v93_v53 = vrot.slane %v85_v42, 2  ;;  %336 = vmatprep.subr.mxu0 %v1654_v26 }
  0xaf   :  { %v125_v47 = vrot.slane %v115_v35, 7  ;;  %v126_v48 = vrot.slane %v118_v36, 7  ;;  %338 = vmatpush1.msra.mxu0 %v1656_v31  ;;  %v440_v46 = vsub.f32 %v1652_v21, %v439_v28  ;;  %v444_v3 = vsub.f32 %v274_v19, %v1654_v26 }
  0xb0   :  { %v1680_v39 = vsub.f32 %v273_v30, %v1656_v31  ;;  %100 = vst [vmem:[#allocation2 + $0x8] ss:$84 sps:$4 sm:$0xc1] %v92_v51   ;;  %101 = vst [vmem:[#allocation2 + $0x48] ss:$-44 sps:$4 sm:$0xc1] %v93_v53   ;;  %v142_v54 = vpop.permute.xlu0 %141  ;;  %521 = vmatprep.subr.mxu0 %v1526_v41  ;;  %377 = vmatmul.mubr.f32.vlgmr.msra.gmra.mxu0 %v1658_v27 }
  0xb1   :  { %133 = vst [vmem:[#allocation2 + $0x8] sm:$0xe] %v125_v47  ;;  %134 = vst [vmem:[#allocation2 + $0x48] sm:$0xe] %v126_v48  ;;  %v49_v4 = vpop.permute.xlu1 %48  ;;  %v144_v61 = vsel %vm143_vm6, %v1548_v56, %v142_v54  ;;  %v147_v0 = vsel %vm143_vm6, %v142_v54, %v1588_v20  ;;  %524 = vmatpush1.msra.mxu0 %v1554_v59  ;;  %575 = vmatprep.mubr.f32.mxu0 %v1406_v2 }
  0xb2   :  { %v53_v57 = vsel %vm52_vm8, %v1598_v32, %v49_v4  ;;  %v56_v60 = vsel %vm52_vm8, %v49_v4, %v1596_v29  ;;  %v154_v9 = vrot.slane %v144_v61, 4  ;;  %v155_v24 = vrot.slane %v147_v0, 4  ;;  %527 = vmatprep.subr.mxu0 %v1534_v45  ;;  %v288_v11 = vld [vmem:[#allocation2 + $0x28] sm:$0xff]  ;;  %v287_v12 = vld [vmem:[#allocation2 + $0x78] sm:$0xff] }
  0xb3   :  { %v63_v1 = vrot.slane %v53_v57, 5  ;;  %v64_v5 = vrot.slane %v56_v60, 5  ;;  %v441_v32 = vand.u32 4294901760, %v440_v46  ;;  %530 = vmatpush1.msra.mxu0 %v1563_v63  ;;  %v445_v29 = vand.u32 4294901760, %v444_v3  ;;  %v284_v41 = vld [vmem:[#allocation2 + $0x38] sm:$0xff] }
  0xb4   :  { %v451_v56 = vand.u32 4294901760, %v1680_v39  ;;  %162 = vst [vmem:[#allocation2 + $0x8] sm:$0x70] %v154_v9  ;;  %163 = vst [vmem:[#allocation2 + $0x48] sm:$0x70] %v155_v24  ;;  %533 = vmatprep.subr.mxu0 %v1613_v43  ;;  %v1714_v13 = vand.u32 4294901760, %v288_v11 }
  0xb5   :  { %71 = vst [vmem:[#allocation2 + $0x58] sm:$0x38] %v63_v1  ;;  %72 = vst [vmem:[#allocation2 + $0x18] sm:$0x38] %v64_v5  ;;  %442 = vmatpush1.msra.mxu1 %v441_v32  ;;  %536 = vmatpush1.msra.mxu0 %v1652_v21  ;;  %v446_v8 = vsub.f32 %v444_v3, %v445_v29  ;;  %v1722_v45 = vand.u32 4294901760, %v287_v12  ;;  %v1727_v59 = vand.u32 4294901760, %v284_v41 }
  0xb6   :  { %v452_v20 = vsub.f32 %v1680_v39, %v451_v56  ;;  %539 = vmatprep.subr.mxu0 %v444_v3  ;;  %v1733_v43 = vsub.f32 %v288_v11, %v1714_v13 }
  0xb7   :  { %v447_v7 = vand.u32 4294901760, %v446_v8  ;;  %542 = vmatpush1.msra.mxu0 %v1680_v39  ;;  %v1741_v15 = vsub.f32 %v287_v12, %v1722_v45  ;;  %v1750_v21 = vsub.f32 %v284_v41, %v1727_v59 }
  0xb8   :  { %v453_v25 = vand.u32 4294901760, %v452_v20  ;;  %693 = vmatprep.subr.mxu0 %v409_v44  ;;  %578 = vmatmul.mubr.f32.vlgmr.msra.gmra.mxu0 %v1603_v34  ;;  %v283_v44 = vld [vmem:[#allocation2 + $0x10] sm:$0xff]  ;;  %v952_v17 = vand.u32 4294901760, %v1733_v43 }
  0xb9   :  { %448 = vmatprep.subr.mxu1 %v447_v7  ;;  %697 = vmatpush1.msra.mxu0 %v415_v62  ;;  %v1730_v63 = vand.u32 4294901760, %v283_v44  ;;  %v964_v35 = vand.u32 4294901760, %v1750_v21 }
  0xba   :  { %454 = vmatpush1.msra.mxu1 %v453_v25  ;;  %701 = vmatprep.subr.mxu0 %v421_v55  ;;  %v953_v40 = vsub.f32 %v1733_v43, %v952_v17 }
  0xbb   :  { %489 = vmatmul.mubr.f32.vlgmr.msra.gmra.mxu1 %v1590_v23  ;;  %609 = vmatprep.subr.mxu1 %v1517_v37  ;;  %v280_v55 = vld [vmem:[#allocation2 + $0x48] sm:$0xff]  ;;  %v1755_v19 = vsub.f32 %v283_v44, %v1730_v63 }
  0xbc   :  { %611 = vmatpush1.msra.mxu1 %v1544_v52  ;;  %705 = vmatpush1.msra.mxu0 %v427_v6  ;;  %v279_v62 = vld [vmem:[#allocation2 + $0x8] sm:$0xff]  ;;  %v276_v6 = vld [vmem:[#allocation2 + $0x18] sm:$0xff] }
  0xbd   :  { %613 = vmatprep.subr.mxu1 %v1520_v38  ;;  %709 = vmatprep.subr.mxu0 %v433_v49  ;;  %v1737_v49 = vand.u32 4294901760, %v280_v55  ;;  %v275_v14 = vld [vmem:[#allocation2 + $0x58] sm:$0xff]  ;;  %v1743_v16 = vand.u32 4294901760, %v279_v62  ;;  %v1747_v18 = vand.u32 4294901760, %v276_v6 }
  0xbe   :  { %615 = vmatpush1.msra.mxu1 %v1551_v58  ;;  %713 = vmatpush1.msra.mxu0 %v439_v28  ;;  %v1757_v30 = vand.u32 4294901760, %v275_v14  ;;  %v958_v28 = vand.u32 4294901760, %v1741_v15 }
  0xbf   :  { %617 = vmatprep.subr.mxu1 %v1600_v33  ;;  %717 = vmatprep.subr.mxu0 %v445_v29  ;;  %v1763_v22 = vsub.f32 %v280_v55, %v1737_v49  ;;  %v1775_v36 = vsub.f32 %v276_v6, %v1747_v18 }
  0xc0   :  { %619 = vmatpush1.msra.mxu1 %v1634_v10  ;;  %656 = vmatprep.mubr.f32.mxu1 %v1406_v2 }
  0xc1   :  { %621 = vmatprep.subr.mxu1 %v1654_v26  ;;  %721 = vmatpush1.msra.mxu0 %v451_v56  ;;  %v976_v42 = vand.u32 4294901760, %v1763_v22  ;;  %v988_v48 = vand.u32 4294901760, %v1775_v36 }
  0xc2   :  { %623 = vmatpush1.msra.mxu1 %v1656_v31  ;;  %754 = vmatprep.mubr.f32.mxu0 %v1406_v2 }
  0xc3   :  { %660 = vmatmul.mubr.f32.vlgmr.msra.gmra.mxu1 %v1617_v50  ;;  %787 = vmatprep.subr.mxu1 %v1517_v37  ;;  %v1768_v37 = vsub.f32 %v279_v62, %v1743_v16  ;;  %v989_v39 = vsub.f32 %v1775_v36, %v988_v48 }
  0xc4   :  { %867 = vmatprep.subr.mxu0 %v1714_v13  ;;  %756 = vmatmul.mubr.f32.vlgmr.msra.gmra.mxu0 %v1590_v23 }
  0xc5   :  { %789 = vmatpush1.msra.mxu1 %v1544_v52  ;;  %869 = vmatpush1.msra.mxu0 %v1722_v45  ;;  %v1780_v52 = vsub.f32 %v275_v14, %v1757_v30  ;;  %v982_v47 = vand.u32 4294901760, %v1768_v37 }
  0xc6   :  { %791 = vmatprep.subr.mxu1 %v1520_v38  ;;  %871 = vmatprep.subr.mxu0 %v1727_v59  ;;  %v970_v38 = vand.u32 4294901760, %v1755_v19 }
  0xc7   :  { %793 = vmatpush1.msra.mxu1 %v1551_v58  ;;  %873 = vmatpush1.msra.mxu0 %v1730_v63  ;;  %v959_v58 = vsub.f32 %v1741_v15, %v958_v28  ;;  %v994_v53 = vand.u32 4294901760, %v1780_v52  ;;  %v983_v3 = vsub.f32 %v1768_v37, %v982_v47 }
  0xc8   :  { %795 = vmatprep.subr.mxu1 %v1600_v33  ;;  %875 = vmatprep.subr.mxu0 %v1737_v49  ;;  %v965_v33 = vsub.f32 %v1750_v21, %v964_v35  ;;  %v971_v51 = vsub.f32 %v1755_v19, %v970_v38 }
  0xc9   :  { %797 = vmatpush1.msra.mxu1 %v1634_v10  ;;  %877 = vmatpush1.msra.mxu0 %v1743_v16  ;;  %v954_v10 = vand.u32 4294901760, %v953_v40  ;;  %v960_v46 = vand.u32 4294901760, %v959_v58  ;;  %v995_v54 = vsub.f32 %v1780_v52, %v994_v53  ;;  %v984_v60 = vand.u32 4294901760, %v983_v3 }
  0xca   :  { %799 = vmatprep.subr.mxu1 %v1654_v26  ;;  %879 = vmatprep.subr.mxu0 %v1747_v18  ;;  %v977_v26 = vsub.f32 %v1763_v22, %v976_v42  ;;  %v972_v4 = vand.u32 4294901760, %v971_v51 }
  0xcb   :  { %801 = vmatpush1.msra.mxu1 %v1656_v31  ;;  %834 = vmatprep.mubr.f32.mxu1 %v1406_v2  ;;  %v966_v31 = vand.u32 4294901760, %v965_v33  ;;  %v996_v61 = vand.u32 4294901760, %v995_v54 }
  0xcc   :  { %881 = vmatpush1.msra.mxu0 %v1757_v30  ;;  %836 = vmatmul.mubr.f32.vlgmr.msra.gmra.mxu1 %v1590_v23  ;;  %v978_v57 = vand.u32 4294901760, %v977_v26 }
  0xcd   :  { %914 = vmatprep.mubr.f32.mxu0 %v1406_v2  ;;  %955 = vmatprep.subr.mxu1 %v954_v10 }
  0xce   :  { %1064 = vmatprep.subr.mxu0 %v1733_v43  ;;  %920 = vmatmul.mubr.f32.vlgmr.msra.gmra.mxu0 %v1658_v27  ;;  %v990_v27 = vand.u32 4294901760, %v989_v39 }
  0xcf   :  { %961 = vmatpush1.msra.mxu1 %v960_v46  ;;  %1067 = vmatpush1.msra.mxu0 %v1741_v15 }
  0xd0   :  { %967 = vmatprep.subr.mxu1 %v966_v31  ;;  %1070 = vmatprep.subr.mxu0 %v1750_v21 }
  0xd1   :  { %973 = vmatpush1.msra.mxu1 %v972_v4  ;;  %1073 = vmatpush1.msra.mxu0 %v1755_v19 }
  0xd2   :  { %979 = vmatprep.subr.mxu1 %v978_v57  ;;  %1076 = vmatprep.subr.mxu0 %v1763_v22 }
  0xd3   :  { %985 = vmatpush1.msra.mxu1 %v984_v60  ;;  %1079 = vmatpush1.msra.mxu0 %v1768_v37 }
  0xd4   :  { %991 = vmatprep.subr.mxu1 %v990_v27  ;;  %1082 = vmatprep.subr.mxu0 %v1775_v36 }
  0xd5   :  { %997 = vmatpush1.msra.mxu1 %v996_v61  ;;  %1030 = vmatprep.mubr.f32.mxu1 %v1406_v2 }
  0xd6   :  { %1085 = vmatpush1.msra.mxu0 %v1780_v52  ;;  %1032 = vmatmul.mubr.f32.vlgmr.msra.gmra.mxu1 %v1590_v23 }
  0xd7   :  { %1118 = vmatprep.mubr.f32.mxu0 %v1406_v2  ;;  %1152 = vmatprep.subr.mxu1 %v1714_v13 }
  0xd8   :  { %1236 = vmatprep.subr.mxu0 %v952_v17  ;;  %1121 = vmatmul.mubr.f32.vlgmr.msra.gmra.mxu0 %v1603_v34 }
  0xd9   :  { %1154 = vmatpush1.msra.mxu1 %v1722_v45  ;;  %1240 = vmatpush1.msra.mxu0 %v958_v28 }
  0xda   :  { %1156 = vmatprep.subr.mxu1 %v1727_v59  ;;  %1244 = vmatprep.subr.mxu0 %v964_v35 }
  0xdb   :  { %1158 = vmatpush1.msra.mxu1 %v1730_v63  ;;  %1248 = vmatpush1.msra.mxu0 %v970_v38 }
  0xdc   :  { %1160 = vmatprep.subr.mxu1 %v1737_v49  ;;  %1252 = vmatprep.subr.mxu0 %v976_v42 }
  0xdd   :  { %1162 = vmatpush1.msra.mxu1 %v1743_v16  ;;  %1256 = vmatpush1.msra.mxu0 %v982_v47 }
  0xde   :  { %1164 = vmatprep.subr.mxu1 %v1747_v18  ;;  %1260 = vmatprep.subr.mxu0 %v988_v48 }
  0xdf   :  { %1166 = vmatpush1.msra.mxu1 %v1757_v30  ;;  %1199 = vmatprep.mubr.f32.mxu1 %v1406_v2 }
  0xe0   :  { %1264 = vmatpush1.msra.mxu0 %v994_v53  ;;  %1203 = vmatmul.mubr.f32.vlgmr.msra.gmra.mxu1 %v1617_v50  ;;  %v293_v50 = vpop.permute.xlu0 %292 }
  0xe1   :  { %1330 = vmatprep.subr.mxu1 %v1714_v13  ;;  %1297 = vmatprep.mubr.f32.mxu0 %v1406_v2 }
  0xe2   :  { %1332 = vmatpush1.msra.mxu1 %v1722_v45  ;;  %1299 = vmatmul.mubr.f32.vlgmr.msra.gmra.mxu0 %v1590_v23 }
  0xe3   :  { %1334 = vmatprep.subr.mxu1 %v1727_v59  ;;  %1377 = vmatprep.mubr.f32.mxu1 %v1406_v2 }
  0xe4   :  { %1336 = vmatpush1.msra.mxu1 %v1730_v63 }
  0xe5   :  { %1338 = vmatprep.subr.mxu1 %v1737_v49 }
  0xe6   :  { %1340 = vmatpush1.msra.mxu1 %v1743_v16 }
  0xe7   :  { %1342 = vmatprep.subr.mxu1 %v1747_v18 }
  0xe8   :  { %1344 = vmatpush1.msra.mxu1 %v1757_v30 }
  0xe9   :  { %1379 = vmatmul.mubr.f32.vlgmr.msra.gmra.mxu1 %v1590_v23 }
 0x170   :  { %v378_v34 = vpop.f32.mrf.mxu0 }
 0x171   :  { %v379_v5 = vadd.f32 %v378_v34, %v293_v50 }
 0x172   :  { %v380_v0 = vpop.f32.mrf.mxu0 }
 0x173   :  { %v381_v9 = vadd.f32 %v380_v0, %v293_v50 }
 0x178   :  { %v579_v2 = vpop.f32.mrf.mxu0 }
 0x17a   :  { %v581_v8 = vpop.f32.mrf.mxu0 }
 0x17b   :  { %v490_v1 = vpop.f32.mrf.mxu1 }
 0x17c   :  { %v491_v32 = vadd.f32 %v490_v1, %v379_v5 }
 0x17d   :  { %v492_v24 = vpop.f32.mrf.mxu1 }
 0x17e   :  { %v493_v29 = vadd.f32 %v492_v24, %v381_v9  ;;  %v580_v20 = vadd.f32 %v579_v2, %v491_v32 }
 0x180   :  { %v582_v11 = vadd.f32 %v581_v8, %v493_v29 }
 0x183   :  { %v661_v56 = vpop.f32.mrf.mxu1 }
 0x184   :  { %v757_v25 = vpop.f32.mrf.mxu0  ;;  %v662_v12 = vadd.f32 %v661_v56, %v580_v20 }
 0x185   :  { %v663_v7 = vpop.f32.mrf.mxu1 }
 0x186   :  { %v664_v13 = vadd.f32 %v663_v7, %v582_v11  ;;  %v759_v41 = vpop.f32.mrf.mxu0  ;;  %v758_v23 = vadd.f32 %v757_v25, %v662_v12 }
 0x188   :  { %v760_v45 = vadd.f32 %v759_v41, %v664_v13 }
 0x18c   :  { %v837_v44 = vpop.f32.mrf.mxu1 }
 0x18d   :  { %v838_v55 = vadd.f32 %v837_v44, %v758_v23 }
 0x18e   :  { %v839_v59 = vpop.f32.mrf.mxu1  ;;  %v921_v63 = vpop.f32.mrf.mxu0 }
 0x18f   :  { %1385 = vst [vmem:[%s1864_s3] sm:$0xff] %v838_v55  ;;  %v840_v62 = vadd.f32 %v839_v59, %v760_v45  ;;  %v922_v49 = vadd.f32 %v921_v63, %v293_v50 }
 0x190   :  { %v923_v6 = vpop.f32.mrf.mxu0 }
 0x191   :  { %1386 = vst [vmem:[%s1864_s3 + $0x8] sm:$0xff] %v840_v62  ;;  %v924_v14 = vadd.f32 %v923_v6, %v293_v50 }
 0x196   :  { %v1033_v43 = vpop.f32.mrf.mxu1 }
 0x197   :  { %v1034_v18 = vadd.f32 %v1033_v43, %v922_v49 }
 0x198   :  { %v1035_v15 = vpop.f32.mrf.mxu1  ;;  %v1122_v16 = vpop.f32.mrf.mxu0 }
 0x199   :  { %v1036_v21 = vadd.f32 %v1035_v15, %v924_v14  ;;  %v1123_v17 = vadd.f32 %v1122_v16, %v1034_v18 }
 0x19a   :  { %v1124_v30 = vpop.f32.mrf.mxu0 }
 0x19b   :  { %v1125_v28 = vadd.f32 %v1124_v30, %v1036_v21 }
 0x1a0   :  { %v1204_v19 = vpop.f32.mrf.mxu1 }
 0x1a1   :  { %v1205_v35 = vadd.f32 %v1204_v19, %v1123_v17 }
 0x1a2   :  { %v1206_v22 = vpop.f32.mrf.mxu1  ;;  %v1300_v37 = vpop.f32.mrf.mxu0 }
 0x1a3   :  { %v1207_v36 = vadd.f32 %v1206_v22, %v1125_v28  ;;  %v1301_v40 = vadd.f32 %v1300_v37, %v1205_v35 }
 0x1a4   :  { %v1302_v52 = vpop.f32.mrf.mxu0 }
 0x1a5   :  { %v1303_v42 = vadd.f32 %v1302_v52, %v1207_v36 }
 0x1a9   :  { %v1380_v38 = vpop.f32.mrf.mxu1 }
 0x1aa   :  { %v1381_v58 = vadd.f32 %v1380_v38, %v1301_v40 }
 0x1ab   :  { %v1382_v47 = vpop.f32.mrf.mxu1 }
 0x1ac   :  { %1387 = vst [vmem:[%s1864_s3 + $0x10] sm:$0xff] %v1381_v58  ;;  %v1383_v33 = vadd.f32 %v1382_v47, %v1303_v42 }
 0x1ae   :  { %1388 = vst [vmem:[%s1864_s3 + $0x18] sm:$0xff] %v1383_v33 }

</bundles_post_ra>
